<compile_context>
chip_gen: v7x
topology: tpu7x:2x2x1
jax: 0.10.0
libtpu: 0.0.40
codegen_flags: <defaults>
</compile_context>

<pallas_src>
import jax
import jax.numpy as jnp
from jax.experimental import pallas as pl
from jax.experimental.pallas import tpu as pltpu

_LANE = 128
_LANE_TILE_THRESHOLD = 32768      # tile the lane axis only beyond this row length
_LANE_TILE = 8192                 # lane-chunk size when the lane axis is tiled
_SMALL_FALLBACK_BYTES = 256 * 1024


def _round_up(a, b):
    return ((a + b - 1) // b) * b


def _gmf_kernel(x_ref, c_ref, a_ref, o_ref):
    # x_ref/o_ref: (tb, tl) tiles; c_ref/a_ref: (1, tl) resident broadcast rows.
    x = x_ref[...].astype(jnp.float32)
    d = x - c_ref[...]
    o_ref[...] = jnp.exp(a_ref[...] * (d * d)).astype(o_ref.dtype)


def _gmf_reference(x, centers, sigmas):
    x32 = x.astype(jnp.float32)
    c32 = centers.astype(jnp.float32)
    s32 = sigmas.astype(jnp.float32)
    out = jnp.exp(-0.5 * ((x32[:, None, :] - c32) / s32) ** 2)
    return out.astype(x.dtype)


def gaussian_membership(x, centers, sigmas, *,
                        block_bytes=6 * 1024 * 1024,
                        small_fallback_bytes=_SMALL_FALLBACK_BYTES,
                        force_pallas=False):
    """x: (B, D), centers: (D,), sigmas: (D,) -> (B, 1, D) = exp(-0.5*((x-c)/s)^2)."""
    B, D = x.shape
    dtype = x.dtype
    itemsize = jnp.dtype(dtype).itemsize

    # Tiny problems: kernel launch + tile padding dominates; let XLA fuse it.
    if (not force_pallas) and B * D * itemsize < small_fallback_bytes:
        return _gmf_reference(x, centers, sigmas)

    c32 = centers.astype(jnp.float32)
    s32 = sigmas.astype(jnp.float32)
    a32 = -0.5 / (s32 * s32)              # hoisted per-element coefficient

    # ---- lane-dense (rows, row_len) view of x (contiguous reshape only, no copies) ----
    fold = 1
    if D % _LANE != 0 and _LANE % D == 0 and B % (_LANE // D) == 0:
        fold = _LANE // D                 # pack `fold` batch rows into one 128-lane row
    rows, row_len = B // fold, D * fold
    xv = x if fold == 1 else x.reshape(rows, row_len)
    cv = jnp.tile(c32, fold).reshape(1, row_len)
    av = jnp.tile(a32, fold).reshape(1, row_len)

    # ---- tile sizes ----
    sub = max(8, 32 // itemsize)          # dtype-aware sublane multiple (8/16/32)
    if row_len > _LANE_TILE_THRESHOLD:
        tl = _LANE_TILE                   # wide-D guard: tile the lane axis too
    else:
        tl = row_len                      # full row; last dim == full array dim is legal

    tb = max(sub, (block_bytes // max(1, tl * itemsize)) // sub * sub)
    # keep >= ~8 grid steps when rows permit (pipelining + megacore split)
    tb = min(tb, max(sub, _round_up(pl.cdiv(rows, 8), sub)))
    tb = min(tb, _round_up(rows, sub))

    grid = (pl.cdiv(rows, tb), pl.cdiv(row_len, tl))

    out = pl.pallas_call(
        _gmf_kernel,
        out_shape=jax.ShapeDtypeStruct((rows, row_len), dtype),
        grid_spec=pltpu.PrefetchScalarGridSpec(
            num_scalar_prefetch=0,
            grid=grid,
            in_specs=[
                pl.BlockSpec((tb, tl), lambda i, j: (i, j)),   # x tile
                pl.BlockSpec((1, tl), lambda i, j: (0, j)),    # centers row
                pl.BlockSpec((1, tl), lambda i, j: (0, j)),    # -0.5/sigma^2 row
            ],
            out_specs=pl.BlockSpec((tb, tl), lambda i, j: (i, j)),
        ),
        compiler_params=pltpu.CompilerParams(
            dimension_semantics=("parallel", "parallel"),
            vmem_limit_bytes=48 * 1024 * 1024,
        ),
    )(xv, cv, av)

    # Undo the fold (contiguous reshape, no copy) and restore the unsqueeze(1) axis.
    return out.reshape(B, 1, D)


if __name__ == "__main__":
    key = jax.random.PRNGKey(0)

    def check(x, centers, sigmas, **kw):
        out = jax.block_until_ready(gaussian_membership(x, centers, sigmas, **kw))
        ref = _gmf_reference(x, centers, sigmas)
        assert out.shape == ref.shape, (out.shape, ref.shape)
        assert jnp.allclose(out, ref, atol=1e-6, rtol=5e-5), \
            float(jnp.max(jnp.abs(out - ref)))

    # 1) Module's native config: input_dim=2, batch=8 (tiny-shape fallback path).
    input_dim = 2
    k1, k2, key = jax.random.split(key, 3)
    centers = jax.random.normal(k1, (input_dim,), dtype=jnp.float32)
    sigmas = jnp.ones((input_dim,), dtype=jnp.float32)
    x = jax.random.normal(k2, (8, input_dim), dtype=jnp.float32)
    check(x, centers, sigmas)

    # 2) Pallas path, tiny-D fold (D=2 -> 64 batch rows packed per 128-lane row).
    k1, k2, k3, key = jax.random.split(key, 4)
    centers = jax.random.normal(k1, (2,), dtype=jnp.float32)
    sigmas = jax.random.uniform(k2, (2,), jnp.float32, 0.5, 1.5)
    x = jax.random.normal(k3, (512, 2), dtype=jnp.float32)
    check(x, centers, sigmas, force_pallas=True)

    # 3) Pallas path, ragged rows + non-128-multiple D (full-D block, masked edge vst).
    k1, k2, k3, key = jax.random.split(key, 4)
    centers = jax.random.normal(k1, (130,), dtype=jnp.float32)
    sigmas = jax.random.uniform(k2, (130,), jnp.float32, 0.5, 1.5)
    x = jax.random.normal(k3, (1000, 130), dtype=jnp.float32)
    check(x, centers, sigmas)

    # 4) Pallas path, lane-aligned D with ragged rows (partial last row block).
    k1, k2, k3, key = jax.random.split(key, 4)
    centers = jax.random.normal(k1, (256,), dtype=jnp.float32)
    sigmas = jax.random.uniform(k2, (256,), jnp.float32, 0.5, 1.5)
    x = jax.random.normal(k3, (300, 256), dtype=jnp.float32)
    check(x, centers, sigmas)

    print("KERNEL_OK")
</pallas_src>

<mosaic_0001>
module attributes {stable_mosaic.version = 11 : i64} {
  func.func @_gmf_kernel(%arg0: i32, %arg1: i32, %arg2: memref<8x128xf32, #tpu.memory_space<vmem>>, %arg3: memref<1x128xf32, #tpu.memory_space<vmem>>, %arg4: memref<1x128xf32, #tpu.memory_space<vmem>>, %arg5: memref<8x128xf32, #tpu.memory_space<vmem>>) attributes {dimension_semantics = [#tpu.dimension_semantics<parallel>, #tpu.dimension_semantics<parallel>], iteration_bounds = array<i64: 1, 1>, scalar_prefetch = 0 : i64, scratch_operands = 0 : i64, tpu.core_type = #tpu.core_type<tc>, window_params = [{transform_indices = @transform_0, window_bounds = array<i64: 8, 128>}, {transform_indices = @transform_1, window_bounds = array<i64: 1, 128>}, {transform_indices = @transform_2, window_bounds = array<i64: 1, 128>}, {transform_indices = @transform_3, window_bounds = array<i64: 8, 128>}]} {
    %c0 = arith.constant 0 : index
    %c0_0 = arith.constant 0 : index
    %0 = vector.load %arg2[%c0, %c0_0] : memref<8x128xf32, #tpu.memory_space<vmem>>, vector<8x128xf32>
    %c0_1 = arith.constant 0 : index
    %c0_2 = arith.constant 0 : index
    %1 = vector.load %arg3[%c0_1, %c0_2] : memref<1x128xf32, #tpu.memory_space<vmem>>, vector<1x128xf32>
    %2 = vector.broadcast %1 : vector<1x128xf32> to vector<8x128xf32>
    %3 = arith.subf %0, %2 : vector<8x128xf32>
    %c0_3 = arith.constant 0 : index
    %c0_4 = arith.constant 0 : index
    %4 = vector.load %arg4[%c0_3, %c0_4] : memref<1x128xf32, #tpu.memory_space<vmem>>, vector<1x128xf32>
    %5 = arith.mulf %3, %3 : vector<8x128xf32>
    %6 = vector.broadcast %4 : vector<1x128xf32> to vector<8x128xf32>
    %7 = arith.mulf %6, %5 : vector<8x128xf32>
    %8 = math.exp %7 : vector<8x128xf32>
    %c0_5 = arith.constant 0 : index
    %c0_6 = arith.constant 0 : index
    %9 = vector.load %arg5[%c0_5, %c0_6] : memref<8x128xf32, #tpu.memory_space<vmem>>, vector<8x128xf32>
    tpu.vector_store %arg5[%c0_5, %c0_6], %8 {strides = array<i32>} : memref<8x128xf32, #tpu.memory_space<vmem>>, vector<8x128xf32>,
    return
  }
  func.func @transform_0(%arg0: i32, %arg1: i32) -> (i32, i32) {
    %c0_i32 = arith.constant 0 : i32
    return %arg0, %arg1 : i32, i32
  }
  func.func @transform_1(%arg0: i32, %arg1: i32) -> (i32, i32) {
    %c0_i32 = arith.constant 0 : i32
    %c0_i32_0 = arith.constant 0 : i32
    return %c0_i32, %arg1 : i32, i32
  }
  func.func @transform_2(%arg0: i32, %arg1: i32) -> (i32, i32) {
    %c0_i32 = arith.constant 0 : i32
    %c0_i32_0 = arith.constant 0 : i32
    return %c0_i32, %arg1 : i32, i32
  }
  func.func @transform_3(%arg0: i32, %arg1: i32) -> (i32, i32) {
    %c0_i32 = arith.constant 0 : i32
    return %arg0, %arg1 : i32, i32
  }
}

</mosaic_0001>

<bundles_post_ra>
// kernel: tpu_custom_call.1
= control target key start
LH: loop header
LB: loop body
LE: loop exit
PB: predicated region body
PF: predicated region fallthrough
CT: control target
= control target key end

     0   :  { %8 = vsyncpa [#allocation3], 0  ;;  %s169_s0 = inlined_call_operand.hbm [shape: f32[8,128], index: 0, kind: input, shape index: {}]   ;;  %s170_s1 = inlined_call_operand.vmem [shape: f32[1,128], index: 1, kind: input, shape index: {}]   ;;  %s171_s2 = inlined_call_operand.vmem [shape: f32[1,128], index: 2, kind: input, shape index: {}]   ;;  %s172_s3 = inlined_call_operand.hbm [shape: f32[8,128], index: 3, kind: output, shape index: {}]  }
   0x1   :  { %9 = vsyncpa [#allocation4], 0  ;;  %s117_s12 = smov [#allocation2]   ;;  %s69_s16 = scalar_lea.hbm %s169_s0, 128 }
   0x2   :  { %s16_s13 = sshll.u32 %s117_s12, 4  ;;  %p70_p0 = scmp.ne.s32.totalorder %s169_s0, %s69_s16  ;;  %s17_s13 = int_to_ptr.vmem [resolvable:$true] %s16_s13 }
   0x3   :  { %p73_p1 = scmp.lt.u32.totalorder %s69_s16, %s169_s0 }
   0x5   :  { %p75_p2 = pnand %p73_p1, %p70_p0 }
   0x7   :  { %78 = shalt.err (!%p75_p2)
}
   0x8   :  { %s79_s21 = scalar_lea.vmem %s17_s13, 128  ;;  %p84_p4 = scmp.lt.s32.totalorder %s17_s13, %s17_s13 }
   0x9   :  { %p80_p3 = scmp.ne.s32.totalorder %s17_s13, %s79_s21  ;;  %p85_p5 = scmp.lt.s32.totalorder %s79_s21, %s79_s21 }
   0xb   :  { %p86_p6 = por %p85_p5, %p84_p4 }
   0xd   :  { %p87_p7 = pnand %p86_p6, %p80_p3 }
   0xf   :  { %90 = shalt.err (!%p87_p7)
}
  0x10   :  { %19 = dma.hbm_to_vmem [thread:$0]  %s169_s0, 128, %s17_s13, [#allocation3]  }
  0x11   :  { %113 = dma.done.wait [#allocation3], 128  }
  0x12   :  { %114 = vsyncadd [#allocation3], 4294967168  ;;  %v27_v0 = vld [vmem:[#allocation2] sm:$0xff]  ;;  %s118_s28 = smov [#allocation5]  }
  0x13   :  { %v63_v1 = vld [vmem:[%s170_s1] ss:$0 sm:$0xff]  ;;  %s54_s29 = sshll.u32 %s118_s28, 4  ;;  %s55_s29 = int_to_ptr.vmem [resolvable:$true] %s54_s29 }
  0x14   :  { %v35_v2 = vsub.f32 %v27_v0, %v63_v1  ;;  %v64_v3 = vld [vmem:[%s171_s2] ss:$0 sm:$0xff]  ;;  %s91_s0 = scalar_lea.vmem %s55_s29, 128  ;;  %p96_p9 = scmp.lt.s32.totalorder %s55_s29, %s55_s29 }
  0x15   :  { %p92_p8 = scmp.ne.s32.totalorder %s55_s29, %s91_s0  ;;  %p97_p10 = scmp.lt.s32.totalorder %s91_s0, %s91_s0 }
  0x16   :  { %v37_v4 = vmul.f32 %v35_v2, %v35_v2 }
  0x17   :  { %p98_p11 = por %p97_p10, %p96_p9 }
  0x18   :  { %v44_v5 = vmul.f32 %v64_v3, %v37_v4 }
  0x19   :  { %p99_p12 = pnand %p98_p11, %p92_p8 }
  0x1a   :  { %v45_v6 = vmul.f32 1.442695, %v44_v5 }
  0x1c   :  { %67 = vpow2.f32 %v45_v6 }
  0x26   :  { %v68_v7 = vpop.eup %67 }
  0x27   :  { %47 = vst [vmem:[#allocation5] sm:$0xff] %v68_v7 }
  0x28   :  { %102 = shalt.err (!%p99_p12)
}
  0x29   :  { %s103_s2 = scalar_lea.hbm %s172_s3, 128 }
  0x2a   :  { %p104_p13 = scmp.ne.s32.totalorder %s172_s3, %s103_s2  ;;  %p107_p0 = scmp.lt.u32.totalorder %s103_s2, %s172_s3 }
  0x2c   :  { %p109_p1 = pnand %p107_p0, %p104_p13 }
  0x2e   :  { %112 = shalt.err (!%p109_p1)
}
  0x2f   :  { %57 = dma.vmem_to_hbm [thread:$0]  %s55_s29, 128, %s172_s3, [#allocation4]  }
  0x30   :  { %115 = dma.done.wait [#allocation4], 128  }
  0x31   :  { %116 = vsyncadd [#allocation4], 4294967168 }
  0x32   :  { %61 = vsyncpa [#allocation3], 1 }
  0x33   :  { %62 = vsyncpa [#allocation4], 1 }

</bundles_post_ra>
